<compile_context>
chip_gen: v7x
topology: tpu7x:2x2x1
jax: 0.10.0
libtpu: 0.0.40
codegen_flags: <defaults>
</compile_context>

<pallas_src>
import functools

import jax
import jax.numpy as jnp
from jax import lax
from jax.experimental import pallas as pl
from jax.experimental.pallas import tpu as pltpu


def _ls_ce_kernel(x_ref, t_ref, o_ref, *, smoothing, n_rows, block_rows):
    """Per-block partial of smoothed cross-entropy over one (block_rows, C) tile."""
    x = x_ref[...].astype(jnp.float32)            # (TN, C), f32 math on all gens
    tn, c = x.shape

    # Numerically-stable logsumexp along the class (lane) axis.  (x - m) is
    # consumed only by exp, so it fuses into the EUP pass (no reused f32 tile).
    m = jnp.max(x, axis=-1, keepdims=True)                                   # (TN, 1)
    lse = m + jnp.log(jnp.sum(jnp.exp(x - m), axis=-1, keepdims=True))       # (TN, 1)

    # Fused smoothed-weight reduction on raw x (sum(weight) == 1):
    #   -sum(weight * log_prob) = lse - sum(weight * x)
    # NOTE: out-of-range targets contribute only the uniform-smoothing term
    # (torch scatter_ with an OOB index is UB; confirm callers never pass -100).
    tgt = t_ref[...].astype(jnp.int32)                                       # (TN, 1)
    col = lax.broadcasted_iota(jnp.int32, (tn, c), 1)
    base = jnp.float32(smoothing / c)
    on_val = jnp.float32(1.0 - smoothing + smoothing / c)
    w = jnp.where(col == tgt, on_val, base)                                  # (TN, C)
    per_row = lse - jnp.sum(w * x, axis=-1, keepdims=True)                   # (TN, 1)

    # Mask rows past the real N (padding); n_rows / block_rows are static.
    row = pl.program_id(0) * block_rows + lax.broadcasted_iota(
        jnp.int32, (tn, 1), 0)
    per_row = jnp.where(row < n_rows, per_row, 0.0)

    # One partial sum per grid block, stored at [0, 0] of a lane-aligned tile.
    partial = jnp.sum(per_row)
    sub = lax.broadcasted_iota(jnp.int32, (1, 8, 128), 1)
    lane = lax.broadcasted_iota(jnp.int32, (1, 8, 128), 2)
    o_ref[...] = jnp.where((sub == 0) & (lane == 0), partial, 0.0)

    # TODO(synk): if still VALU-bound for bf16 logits with C >= ~1-2k on
    # v6e/v7x, offload the lane sums to the idle MXU via
    # jnp.dot(vals, ones((C, 1), f32)), and sweep pipeline_mode=pl.Buffered(3)
    # for the small-C / short-step regime.


def _round_up(x, m):
    return ((x + m - 1) // m) * m


def _cdiv(a, b):
    return -(-a // b)


def _pick_block_rows(n, c, itemsize):
    # Budget the *total* per-step footprint (~4 MiB): double-buffered input
    # tile (2 * itemsize bytes/elem) plus ~8 bytes/elem of in-kernel f32
    # temporaries (upcast + exp pass).  Safe against the 32 MiB scoped VMEM
    # default and v7x's 64 MiB physical budget.
    budget = 4 * 1024 * 1024
    bytes_per_row = max(1, c * (2 * itemsize + 8))
    rows = max(8, (budget // bytes_per_row) // 8 * 8)
    # Keep >= ~4 grid blocks (when N allows) so the "parallel" axis can be
    # split across v7x's two TensorCores; costs ~nothing on v5e/v6e.
    rows = min(rows, max(8, _round_up(_cdiv(n, 4), 8)))
    # Don't pad tiny problems up to a huge block.
    return min(rows, _round_up(n, 8))


def label_smoothing_cross_entropy(inputs, target, smoothing=0.1, block_rows=None):
    """inputs: (N, C) float logits; target: (N,) int labels. Returns scalar f32 loss."""
    n, c = inputs.shape
    itemsize = jnp.dtype(inputs.dtype).itemsize

    if block_rows is None:
        block_rows = _pick_block_rows(n, c, itemsize)
    else:
        block_rows = max(8, (int(block_rows) // 8) * 8)
        block_rows = min(block_rows, _round_up(n, 8))

    n_pad = _round_up(n, block_rows)
    num_blocks = n_pad // block_rows

    x = inputs                         # keep storage dtype (e.g. bf16) for the DMA
    tgt2d = target.astype(jnp.int32).reshape(n, 1)
    if n_pad != n:
        x = jnp.pad(x, ((0, n_pad - n), (0, 0)))
        tgt2d = jnp.pad(tgt2d, ((0, n_pad - n), (0, 0)))

    kernel = functools.partial(
        _ls_ce_kernel, smoothing=float(smoothing), n_rows=n, block_rows=block_rows)

    # TODO(synk): for LM-scale C (32k-256k classes) add a class-tiled
    # online-logsumexp variant; row-only tiling is fine for re-rank-sized C.
    partials = pl.pallas_call(
        kernel,
        out_shape=jax.ShapeDtypeStruct((num_blocks, 8, 128), jnp.float32),
        grid_spec=pltpu.PrefetchScalarGridSpec(
            num_scalar_prefetch=0,
            grid=(num_blocks,),
            in_specs=[
                pl.BlockSpec((block_rows, c), lambda i: (i, 0)),
                pl.BlockSpec((block_rows, 1), lambda i: (i, 0)),
            ],
            out_specs=pl.BlockSpec((1, 8, 128), lambda i: (i, 0, 0)),
        ),
        compiler_params=pltpu.CompilerParams(
            dimension_semantics=("parallel",),   # lets v7x shard blocks over 2 TCs
            vmem_limit_bytes=32 * 1024 * 1024,
        ),
    )(x, tgt2d)

    # num_blocks scalars -> mean over the real N (tiny work; stays in XLA).
    return jnp.sum(partials[:, 0, 0]) / jnp.float32(n)


def _reference(inputs, target, smoothing=0.1):
    n, c = inputs.shape
    log_prob = jax.nn.log_softmax(inputs.astype(jnp.float32), axis=-1)
    weight = jnp.full((n, c), smoothing / c, dtype=jnp.float32)
    weight = weight.at[jnp.arange(n), target].set(1.0 - smoothing + smoothing / c)
    return jnp.mean(jnp.sum(-weight * log_prob, axis=-1))


if __name__ == "__main__":
    key = jax.random.PRNGKey(0)

    # Case 1: small, divides evenly (single block).
    k1, k2, k3, k4 = jax.random.split(key, 4)
    N1, C1 = 8, 32
    logits1 = jax.random.normal(k1, (N1, C1), dtype=jnp.float32)
    targets1 = jax.random.randint(k2, (N1,), 0, C1, dtype=jnp.int32)
    loss1 = jax.block_until_ready(
        label_smoothing_cross_entropy(logits1, targets1, smoothing=0.1))
    ref1 = _reference(logits1, targets1, smoothing=0.1)
    assert jnp.allclose(loss1, ref1, atol=1e-5, rtol=1e-5), (loss1, ref1)

    # Case 2: ragged N (exercises multi-block grid, row padding + in-kernel
    # masking) and non-128 C.
    N2, C2 = 20, 48
    logits2 = jax.random.normal(k3, (N2, C2), dtype=jnp.float32)
    targets2 = jax.random.randint(k4, (N2,), 0, C2, dtype=jnp.int32)
    loss2 = jax.block_until_ready(
        label_smoothing_cross_entropy(logits2, targets2, smoothing=0.1))
    ref2 = _reference(logits2, targets2, smoothing=0.1)
    assert jnp.allclose(loss2, ref2, atol=1e-5, rtol=1e-5), (loss2, ref2)

    print("KERNEL_OK")
</pallas_src>

<mosaic_0001>
module attributes {stable_mosaic.version = 11 : i64} {
  func.func @_ls_ce_kernel(%arg0: i32, %arg1: memref<8x32xf32, #tpu.memory_space<vmem>>, %arg2: memref<8x1xi32, #tpu.memory_space<vmem>>, %arg3: memref<1x8x128xf32, #tpu.memory_space<vmem>>) attributes {dimension_semantics = [#tpu.dimension_semantics<parallel>], iteration_bounds = array<i64: 1>, scalar_prefetch = 0 : i64, scratch_operands = 0 : i64, tpu.core_type = #tpu.core_type<tc>, window_params = [{transform_indices = @transform_0, window_bounds = array<i64: 8, 32>}, {transform_indices = @transform_1, window_bounds = array<i64: 8, 1>}, {transform_indices = @transform_2, window_bounds = array<i64: 1, 8, 128>}]} {
    %c0 = arith.constant 0 : index
    %c0_0 = arith.constant 0 : index
    %0 = vector.load %arg1[%c0, %c0_0] : memref<8x32xf32, #tpu.memory_space<vmem>>, vector<8x32xf32>
    %cst = arith.constant dense<0xFF800000> : vector<8xf32>
    %1 = vector.multi_reduction <maximumf>, %0, %cst [1] : vector<8x32xf32> to vector<8xf32>
    %2 = vector.shape_cast %1 : vector<8xf32> to vector<8x1xf32>
    %3 = vector.broadcast %2 : vector<8x1xf32> to vector<8x32xf32>
    %4 = arith.subf %0, %3 : vector<8x32xf32>
    %5 = math.exp %4 : vector<8x32xf32>
    %cst_1 = arith.constant dense<0.000000e+00> : vector<8xf32>
    %6 = vector.multi_reduction <add>, %5, %cst_1 [1] : vector<8x32xf32> to vector<8xf32>
    %7 = vector.shape_cast %6 : vector<8xf32> to vector<8x1xf32>
    %8 = math.log %7 : vector<8x1xf32>
    %9 = arith.addf %2, %8 : vector<8x1xf32>
    %c0_2 = arith.constant 0 : index
    %c0_3 = arith.constant 0 : index
    %10 = vector.load %arg2[%c0_2, %c0_3] : memref<8x1xi32, #tpu.memory_space<vmem>>, vector<8x1xi32>
    %11 = tpu.iota {dimensions = array<i32: 1>} : vector<8x32xi32>
    %12 = vector.broadcast %10 : vector<8x1xi32> to vector<8x32xi32>
    %13 = arith.cmpi eq, %11, %12 : vector<8x32xi32>
    %cst_4 = arith.constant 0.903124988 : f32
    %cst_5 = arith.constant 3.125000e-03 : f32
    %14 = vector.broadcast %cst_4 : f32 to vector<8x32xf32>
    %15 = vector.broadcast %cst_5 : f32 to vector<8x32xf32>
    %16 = arith.select %13, %14, %15 : vector<8x32xi1>, vector<8x32xf32>
    %17 = arith.mulf %16, %0 : vector<8x32xf32>
    %cst_6 = arith.constant dense<0.000000e+00> : vector<8xf32>
    %18 = vector.multi_reduction <add>, %17, %cst_6 [1] : vector<8x32xf32> to vector<8xf32>
    %19 = vector.shape_cast %18 : vector<8xf32> to vector<8x1xf32>
    %20 = arith.subf %9, %19 : vector<8x1xf32>
    %c8_i32 = arith.constant 8 : i32
    %21 = arith.muli %arg0, %c8_i32 : i32
    %22 = tpu.iota {dimensions = array<i32: 0>} : vector<8x1xi32>
    %23 = vector.broadcast %21 : i32 to vector<8x1xi32>
    %24 = arith.addi %23, %22 : vector<8x1xi32>
    %c8_i32_7 = arith.constant 8 : i32
    %25 = vector.broadcast %c8_i32_7 : i32 to vector<8x1xi32>
    %26 = arith.cmpi slt, %24, %25 : vector<8x1xi32>
    %cst_8 = arith.constant 0.000000e+00 : f32
    %27 = vector.broadcast %cst_8 : f32 to vector<8x1xf32>
    %28 = arith.select %26, %20, %27 : vector<8x1xi1>, vector<8x1xf32>
    %29 = vector.shape_cast %28 : vector<8x1xf32> to vector<1x8x1xf32>
    %cst_9 = arith.constant dense<0.000000e+00> : vector<1xf32>
    %30 = vector.multi_reduction <add>, %29, %cst_9 [1, 2] : vector<1x8x1xf32> to vector<1xf32>
    %31 = vector.shape_cast %30 : vector<1xf32> to vector<1x1x1xf32>
    %32 = vector.extract %31[0, 0, 0] : f32 from vector<1x1x1xf32>
    %33 = tpu.iota {dimensions = array<i32: 1>} : vector<1x8x128xi32>
    %34 = tpu.iota {dimensions = array<i32: 2>} : vector<1x8x128xi32>
    %c0_i32 = arith.constant 0 : i32
    %35 = vector.broadcast %c0_i32 : i32 to vector<1x8x128xi32>
    %36 = arith.cmpi eq, %33, %35 : vector<1x8x128xi32>
    %c0_i32_10 = arith.constant 0 : i32
    %37 = vector.broadcast %c0_i32_10 : i32 to vector<1x8x128xi32>
    %38 = arith.cmpi eq, %34, %37 : vector<1x8x128xi32>
    %39 = arith.andi %36, %38 : vector<1x8x128xi1>
    %cst_11 = arith.constant 0.000000e+00 : f32
    %40 = vector.broadcast %32 : f32 to vector<1x8x128xf32>
    %41 = vector.broadcast %cst_11 : f32 to vector<1x8x128xf32>
    %42 = arith.select %39, %40, %41 : vector<1x8x128xi1>, vector<1x8x128xf32>
    %c0_12 = arith.constant 0 : index
    %c0_13 = arith.constant 0 : index
    %c0_14 = arith.constant 0 : index
    %43 = vector.load %arg3[%c0_12, %c0_13, %c0_14] : memref<1x8x128xf32, #tpu.memory_space<vmem>>, vector<1x8x128xf32>
    tpu.vector_store %arg3[%c0_12, %c0_13, %c0_14], %42 {strides = array<i32>} : memref<1x8x128xf32, #tpu.memory_space<vmem>>, vector<1x8x128xf32>,
    return
  }
  func.func @transform_0(%arg0: i32) -> (i32, i32) {
    %c0_i32 = arith.constant 0 : i32
    %c0_i32_0 = arith.constant 0 : i32
    return %arg0, %c0_i32 : i32, i32
  }
  func.func @transform_1(%arg0: i32) -> (i32, i32) {
    %c0_i32 = arith.constant 0 : i32
    %c0_i32_0 = arith.constant 0 : i32
    return %arg0, %c0_i32 : i32, i32
  }
  func.func @transform_2(%arg0: i32) -> (i32, i32, i32) {
    %c0_i32 = arith.constant 0 : i32
    %c0_i32_0 = arith.constant 0 : i32
    %c0_i32_1 = arith.constant 0 : i32
    return %arg0, %c0_i32, %c0_i32_0 : i32, i32, i32
  }
}

</mosaic_0001>

<bundles_post_ra>
// kernel: tpu_custom_call.1
= control target key start
LH: loop header
LB: loop body
LE: loop exit
PB: predicated region body
PF: predicated region fallthrough
CT: control target
= control target key end

     0   :  { %vm13_vm0 = vcmask 261120   ;;  %s150_s0 = inlined_call_operand.vmem [shape: f32[8,32], index: 0, kind: input, shape index: {}]   ;;  %s151_s1 = inlined_call_operand.vmem [shape: s32[8,1], index: 1, kind: input, shape index: {}]   ;;  %s152_s2 = inlined_call_operand.hbm [shape: f32[1,8,128], index: 2, kind: output, shape index: {}]  }
   0x1   :  { %v12_v0 = vld [vmem:[%s150_s0] sm:$0xff] }
   0x2   :  { %7 = vsyncpa [#allocation3], 0  ;;  %v14_v1 = vsel %vm13_vm0, %v12_v0, -inf  ;;  %v111_v2 = vmov 0   ;;  %v26_v3 = vld [vmem:[%s151_s1] sm:$0xff]  ;;  %v27_v6 = vlaneseq  ;;  %vm46_vm2 = vcmask 7168  }
   0x3   :  { %82 = vset.pattern.permute.xlu0 %v111_v2  ;;  %v112_v10 = vmov 0.003125   ;;  %s113_s0 = smov [#allocation2]  }
   0x4   :  { %15 = vmax.xlane.f32.xlu0 %v14_v1  ;;  %v28_v8 = vand.u32 127, %v27_v6  ;;  %v41_v30 = vshrl.u32 %v27_v6, 7  ;;  %s69_s1 = sshll.u32 %s113_s0, 4  ;;  %s70_s1 = int_to_ptr.vmem [resolvable:$true] %s69_s1 }
   0x5   :  { %s87_s14 = scalar_lea.vmem %s70_s1, 128  ;;  %p92_p1 = scmp.lt.s32.totalorder %s70_s1, %s70_s1 }
   0x6   :  { %vm57_vm3 = vcmp.eq.s32.totalorder %v41_v30, 0  ;;  %vm58_vm4 = vcmp.eq.s32.totalorder %v28_v8, 0  ;;  %p88_p0 = scmp.ne.s32.totalorder %s70_s1, %s87_s14  ;;  %p93_p2 = scmp.lt.s32.totalorder %s87_s14, %s87_s14 }
   0x7   :  { %vm59_vm5 = vmand %vm57_vm3, %vm58_vm4 }
   0x8   :  { %p94_p3 = por %p93_p2, %p92_p1 }
   0xa   :  { %p95_p4 = pnand %p94_p3, %p88_p0 }
  0x1a   :  { %30 = vperm.xlu0 %82, %v26_v3  }
  0x91   :  { %v16_v4 = vpop.xlane.xlu0 %15 }
  0x92   :  { %v17_v5 = vsub.f32 %v12_v0, %v16_v4 }
  0x94   :  { %v18_v7 = vmul.f32 1.442695, %v17_v5 }
  0x96   :  { %83 = vpow2.f32 %v18_v7 }
  0x99   :  { %v31_v9 = vpop.permute.xlu0 %30 }
  0x9a   :  { %vm32_vm1 = vcmp.eq.s32.totalorder %v28_v8, %v31_v9 }
  0x9b   :  { %v33_v11 = vsel %vm32_vm1, 0.903125, %v112_v10 }
  0x9c   :  { %v34_v12 = vmul.f32 %v33_v11, %v12_v0 }
  0x9e   :  { %v35_v15 = vsel %vm13_vm0, %v34_v12, 0.0 }
  0xa0   :  { %v84_v13 = vpop.eup %83 }
  0xa1   :  { %v20_v14 = vsel %vm13_vm0, %v84_v13, 0.0 }
  0xa2   :  { %21 = vadd.xlane.f32.xlu1 %v20_v14 }
  0xa6   :  { %36 = vadd.xlane.f32.xlu1 %v35_v15 }
 0x12f   :  { %v22_v16 = vpop.xlane.xlu1 %21 }
 0x130   :  { %85 = vlog2.f32 %v22_v16 }
 0x133   :  { %v37_v19 = vpop.xlane.xlu1 %36 }
 0x13a   :  { %v86_v17 = vpop.eup %85 }
 0x13b   :  { %v24_v18 = vmul.f32 0.6931472, %v86_v17 }
 0x13d   :  { %v25_v20 = vadd.f32 %v24_v18, %v16_v4 }
 0x13f   :  { %v38_v21 = vsub.f32 %v25_v20, %v37_v19 }
 0x141   :  { %v47_v22 = vsel %vm46_vm2, %v38_v21, 0.0 }
 0x142   :  { %48 = vadd.xlane.f32.xlu1 %v47_v22 }
 0x1cf   :  { %v49_v23 = vpop.xlane.xlu1 %48 }
 0x1d0   :  { %v50_v24 = vrot.slane %v49_v23, 4 }
 0x1d2   :  { %v51_v25 = vadd.f32 %v50_v24, %v49_v23 }
 0x1d4   :  { %v52_v26 = vrot.slane %v51_v25, 2 }
 0x1d6   :  { %v53_v27 = vadd.f32 %v52_v26, %v51_v25 }
 0x1d8   :  { %v54_v28 = vrot.slane %v53_v27, 1 }
 0x1da   :  { %v55_v29 = vadd.f32 %v54_v28, %v53_v27 }
 0x1dc   :  { %77 = vpush %v55_v29 }
 0x20d   :  { %s78_s13 = spop %77 }
 0x20e   :  { %v60_v31 = vstv %s78_s13 }
 0x20f   :  { %v61_v32 = vsel %vm59_vm5, %v60_v31, 0.0 }
 0x210   :  { %62 = vst [vmem:[#allocation2] sm:$0xff] %v61_v32 }
 0x211   :  { %98 = shalt.err (!%p95_p4)
}
 0x212   :  { %s99_s17 = scalar_lea.hbm %s152_s2, 128 }
 0x213   :  { %p100_p5 = scmp.ne.s32.totalorder %s152_s2, %s99_s17  ;;  %p103_p6 = scmp.lt.u32.totalorder %s99_s17, %s152_s2 }
 0x215   :  { %p105_p7 = pnand %p103_p6, %p100_p5 }
 0x217   :  { %108 = shalt.err (!%p105_p7)
}
 0x218   :  { %72 = dma.vmem_to_hbm [thread:$0]  %s70_s1, 128, %s152_s2, [#allocation3]  }
 0x219   :  { %109 = dma.done.wait [#allocation3], 128  }
 0x21a   :  { %110 = vsyncadd [#allocation3], 4294967168 }
 0x21b   :  { %76 = vsyncpa [#allocation3], 1 }

</bundles_post_ra>
